<compile_context>
chip_gen: v7x
topology: tpu7x:2x2x1
jax: 0.10.0
libtpu: 0.0.40
codegen_flags: <defaults>
</compile_context>

<pallas_src>
import functools
import math

import jax
import jax.numpy as jnp
from jax.experimental import pallas as pl
from jax.experimental.pallas import tpu as pltpu


def _round_up(x, m):
    return (x + m - 1) // m * m


def noise_reg_kernel(x_ref, noise_ref, w_ref, norm_ref, *, epsilon, mode):
    """One row tile: noise -> eta -> x_new -> (x_new - x) @ W -> per-row L2 norm."""
    x = x_ref[...]            # (TB, D) float32, values in [0, 1]
    n = noise_ref[...]        # (TB, D) float32 raw noise

    if mode == "gaussian":
        eta = epsilon * n
    else:
        # torch renorm_(p=2, dim=0, maxnorm=eps): each per-sample slice whose
        # L2 norm exceeds eps is rescaled by eps / (norm + 1e-7).
        nrm = jnp.sqrt(jnp.sum(n * n, axis=-1, keepdims=True))          # (TB, 1)
        scale = jnp.where(nrm > epsilon, epsilon / (nrm + 1e-7), 1.0)   # (TB, 1)
        eta = n * scale

    x_new = jnp.clip(x + eta, 0.0, 1.0)           # clamp(x + eta, 0, 1)

    # Affine model => model(x_new) - model(x) == (x_new - x) @ W (bias cancels).
    diff = jnp.dot(x_new - x, w_ref[...], preferred_element_type=jnp.float32)  # (TB, H)

    # torch.norm(., 2, dim=-1) per row.
    norm_ref[...] = jnp.sqrt(jnp.sum(diff * diff, axis=-1, keepdims=True))     # (TB, 1)


def noise_reg(x, noise, w, *, epsilon, mode, tile_b=128):
    """NoiseReg forward. x: [B, ...], noise: same shape, w: [D, H] with D = prod(x.shape[1:])."""
    B = x.shape[0]
    D = math.prod(x.shape[1:])
    H = w.shape[1]

    x2 = jnp.reshape(x, (B, D)).astype(jnp.float32)
    n2 = jnp.reshape(noise, (B, D)).astype(jnp.float32)

    TB = min(tile_b, _round_up(B, 8))          # sublane-aligned row tile
    B_pad = _round_up(B, TB)
    if B_pad != B:
        pad = ((0, B_pad - B), (0, 0))         # padded rows produce norm 0 and are sliced off
        x2 = jnp.pad(x2, pad)
        n2 = jnp.pad(n2, pad)

    kernel = functools.partial(noise_reg_kernel, epsilon=float(epsilon), mode=mode)

    row_norms = pl.pallas_call(
        kernel,
        out_shape=jax.ShapeDtypeStruct((B_pad, 1), jnp.float32),
        grid=(B_pad // TB,),
        in_specs=[
            pl.BlockSpec((TB, D), lambda i: (i, 0)),   # x rows
            pl.BlockSpec((TB, D), lambda i: (i, 0)),   # noise rows
            pl.BlockSpec((D, H), lambda i: (0, 0)),    # model weights (resident)
        ],
        out_specs=pl.BlockSpec((TB, 1), lambda i: (i, 0)),
        compiler_params=pltpu.CompilerParams(
            dimension_semantics=("parallel",)),
    )(x2, n2, w.astype(jnp.float32))

    return jnp.mean(row_norms[:B, 0])


def noise_reg_ref(x, noise, w, b, *, epsilon, mode):
    """Pure-JAX line-by-line port of the PyTorch forward (affine model, bias kept)."""
    B = x.shape[0]
    x2 = jnp.reshape(x, (B, -1)).astype(jnp.float32)
    n2 = jnp.reshape(noise, (B, -1)).astype(jnp.float32)
    if mode == "gaussian":
        eta = epsilon * n2
    else:
        nrm = jnp.sqrt(jnp.sum(n2 * n2, axis=-1, keepdims=True))
        scale = jnp.where(nrm > epsilon, epsilon / (nrm + 1e-7), 1.0)
        eta = n2 * scale
    x_new = jnp.clip(x2 + eta, 0.0, 1.0)
    y1 = x_new @ w + b
    y0 = x2 @ w + b
    return jnp.mean(jnp.sqrt(jnp.sum((y1 - y0) ** 2, axis=-1)))


if __name__ == "__main__":
    key = jax.random.PRNGKey(0)
    kx, kw, kb, kg, ku = jax.random.split(key, 5)

    B, C, S = 2, 4, 16          # batch=2, channels=4, spatial=16x16
    H = 32                      # model output width
    D = C * S * S               # 1024 flattened input features

    x = jax.random.uniform(kx, (B, C, S, S), dtype=jnp.float32)       # image-like, in [0, 1]
    w = jax.random.normal(kw, (D, H), dtype=jnp.float32) / jnp.sqrt(D)
    b = 0.1 * jax.random.normal(kb, (H,), dtype=jnp.float32)
    epsilon = 0.1

    for mode, kn in (("gaussian", kg), ("uniform", ku)):
        if mode == "gaussian":
            noise = jax.random.normal(kn, x.shape, dtype=jnp.float32)
        else:
            noise = jax.random.uniform(kn, x.shape, dtype=jnp.float32,
                                       minval=-1.0, maxval=1.0)

        out = jax.block_until_ready(noise_reg(x, noise, w, epsilon=epsilon, mode=mode))
        ref = noise_reg_ref(x, noise, w, b, epsilon=epsilon, mode=mode)

        assert jnp.isfinite(out), (mode, float(out))
        assert jnp.allclose(out, ref, rtol=1e-3, atol=1e-6), (mode, float(out), float(ref))

    print("KERNEL_OK")
</pallas_src>

<mosaic_0001>
module attributes {stable_mosaic.version = 11 : i64} {
  func.func @noise_reg_kernel(%arg0: i32, %arg1: memref<8x1024xf32, #tpu.memory_space<vmem>>, %arg2: memref<8x1024xf32, #tpu.memory_space<vmem>>, %arg3: memref<1024x32xf32, #tpu.memory_space<vmem>>, %arg4: memref<8x1xf32, #tpu.memory_space<vmem>>) attributes {dimension_semantics = [#tpu.dimension_semantics<parallel>], iteration_bounds = array<i64: 1>, scalar_prefetch = 0 : i64, scratch_operands = 0 : i64, tpu.core_type = #tpu.core_type<tc>, window_params = [{transform_indices = @transform_0, window_bounds = array<i64: 8, 1024>}, {transform_indices = @transform_1, window_bounds = array<i64: 8, 1024>}, {pipeline_mode = #tpu.pipeline_mode<synchronous>, transform_indices = @transform_2, window_bounds = array<i64: 1024, 32>}, {transform_indices = @transform_3, window_bounds = array<i64: 8, 1>}]} {
    %c0 = arith.constant 0 : index
    %c0_0 = arith.constant 0 : index
    %0 = vector.load %arg1[%c0, %c0_0] : memref<8x1024xf32, #tpu.memory_space<vmem>>, vector<8x1024xf32>
    %c0_1 = arith.constant 0 : index
    %c0_2 = arith.constant 0 : index
    %1 = vector.load %arg2[%c0_1, %c0_2] : memref<8x1024xf32, #tpu.memory_space<vmem>>, vector<8x1024xf32>
    %cst = arith.constant 1.000000e-01 : f32
    %2 = vector.broadcast %cst : f32 to vector<8x1024xf32>
    %3 = arith.mulf %2, %1 : vector<8x1024xf32>
    %4 = arith.addf %0, %3 : vector<8x1024xf32>
    %cst_3 = arith.constant 0.000000e+00 : f32
    %cst_4 = arith.constant 1.000000e+00 : f32
    %5 = vector.broadcast %cst_3 : f32 to vector<8x1024xf32>
    %6 = arith.maximumf %5, %4 : vector<8x1024xf32>
    %7 = vector.broadcast %cst_4 : f32 to vector<8x1024xf32>
    %8 = arith.minimumf %7, %6 : vector<8x1024xf32>
    %9 = arith.subf %8, %0 : vector<8x1024xf32>
    %c0_5 = arith.constant 0 : index
    %c0_6 = arith.constant 0 : index
    %10 = vector.load %arg3[%c0_5, %c0_6] : memref<1024x32xf32, #tpu.memory_space<vmem>>, vector<1024x32xf32>
    %cst_7 = arith.constant dense<0.000000e+00> : vector<8x32xf32>
    %11 = tpu.matmul %9, %10, %cst_7 {dimension_numbers = #tpu.dot_dimension_numbers<[1], [0], [0], [1], [0, 0, 1, 1], [], []>} : vector<8x1024xf32>, vector<1024x32xf32>, vector<8x32xf32> -> vector<8x32xf32>
    %12 = arith.mulf %11, %11 : vector<8x32xf32>
    %cst_8 = arith.constant dense<0.000000e+00> : vector<8xf32>
    %13 = vector.multi_reduction <add>, %12, %cst_8 [1] : vector<8x32xf32> to vector<8xf32>
    %14 = vector.shape_cast %13 : vector<8xf32> to vector<8x1xf32>
    %15 = math.sqrt %14 : vector<8x1xf32>
    %c0_9 = arith.constant 0 : index
    %c0_10 = arith.constant 0 : index
    %16 = vector.load %arg4[%c0_9, %c0_10] : memref<8x1xf32, #tpu.memory_space<vmem>>, vector<8x1xf32>
    tpu.vector_store %arg4[%c0_9, %c0_10], %15 {strides = array<i32>} : memref<8x1xf32, #tpu.memory_space<vmem>>, vector<8x1xf32>,
    return
  }
  func.func @transform_0(%arg0: i32) -> (i32, i32) {
    %c0_i32 = arith.constant 0 : i32
    %c0_i32_0 = arith.constant 0 : i32
    return %arg0, %c0_i32 : i32, i32
  }
  func.func @transform_1(%arg0: i32) -> (i32, i32) {
    %c0_i32 = arith.constant 0 : i32
    %c0_i32_0 = arith.constant 0 : i32
    return %arg0, %c0_i32 : i32, i32
  }
  func.func @transform_2(%arg0: i32) -> (i32, i32) {
    %c0_i32 = arith.constant 0 : i32
    %c0_i32_0 = arith.constant 0 : i32
    %c0_i32_1 = arith.constant 0 : i32
    return %c0_i32, %c0_i32_0 : i32, i32
  }
  func.func @transform_3(%arg0: i32) -> (i32, i32) {
    %c0_i32 = arith.constant 0 : i32
    %c0_i32_0 = arith.constant 0 : i32
    return %arg0, %c0_i32 : i32, i32
  }
}

</mosaic_0001>

<bundles_post_ra>
// kernel: tpu_custom_call.1
= control target key start
LH: loop header
LB: loop body
LE: loop exit
PB: predicated region body
PF: predicated region fallthrough
CT: control target
= control target key end

     0   :  { %vm479_vm0 = vcmask 261120   ;;  %vm490_vm2 = vcmask 7168   ;;  %s1245_s2 = inlined_call_operand.vmem [shape: f32[1024,32], index: 2, kind: input, shape index: {}]   ;;  %s1246_s0 = inlined_call_operand.vmem [shape: f32[8,1024], index: 0, kind: input, shape index: {}]   ;;  %s1247_s1 = inlined_call_operand.vmem [shape: f32[8,1024], index: 1, kind: input, shape index: {}]   ;;  %s1248_s3 = inlined_call_operand.vmem [shape: f32[8,1], index: 3, kind: output, shape index: {}]  }
   0x1   :  { %v86_v0 = vld [vmem:[%s1245_s2 + $0x80] sm:$0xff]  ;;  %v87_v1 = vld [vmem:[%s1245_s2 + $0x88] sm:$0xff]  ;;  %v88_v11 = vld [vmem:[%s1245_s2 + $0x90] sm:$0xff] }
   0x2   :  { %v118_v2 = vld [vmem:[%s1245_s2 + $0x180] sm:$0xff]  ;;  %v636_v3 = vpack.c.bf16 %v87_v1, %v86_v0  ;;  %v119_v4 = vld [vmem:[%s1245_s2 + $0x188] sm:$0xff]  ;;  %v89_v13 = vld [vmem:[%s1245_s2 + $0x98] sm:$0xff] }
   0x3   :  { %v70_v5 = vld [vmem:[%s1245_s2] sm:$0xff]  ;;  %v71_v6 = vld [vmem:[%s1245_s2 + $0x8] sm:$0xff]  ;;  %v668_v7 = vpack.c.bf16 %v119_v4, %v118_v2  ;;  %v120_v14 = vld [vmem:[%s1245_s2 + $0x190] sm:$0xff]  ;;  %v640_v16 = vpack.c.bf16 %v89_v13, %v88_v11 }
   0x4   :  { %v638_v8 = vpack.c.bf16 %v71_v6, %v70_v5  ;;  %v102_v9 = vld [vmem:[%s1245_s2 + $0x100] sm:$0xff]  ;;  %v103_v10 = vld [vmem:[%s1245_s2 + $0x108] sm:$0xff]  ;;  %637 = vmatprep.subr.bf16.mxu0 %v636_v3  ;;  %v121_v15 = vld [vmem:[%s1245_s2 + $0x198] sm:$0xff] }
   0x5   :  { %v670_v12 = vpack.c.bf16 %v103_v10, %v102_v9  ;;  %669 = vmatprep.subr.bf16.mxu1 %v668_v7  ;;  %v672_v17 = vpack.c.bf16 %v121_v15, %v120_v14  ;;  %v72_v18 = vld [vmem:[%s1245_s2 + $0x10] sm:$0xff]  ;;  %v73_v19 = vld [vmem:[%s1245_s2 + $0x18] sm:$0xff]  ;;  %v90_v23 = vld [vmem:[%s1245_s2 + $0xa0] sm:$0xff] }
   0x6   :  { %639 = vmatpush3.bf16.msra.mxu0 %v638_v8  ;;  %v104_v20 = vld [vmem:[%s1245_s2 + $0x110] sm:$0xff]  ;;  %v642_v21 = vpack.c.bf16 %v73_v19, %v72_v18  ;;  %v105_v22 = vld [vmem:[%s1245_s2 + $0x118] sm:$0xff]  ;;  %v91_v24 = vld [vmem:[%s1245_s2 + $0xa8] sm:$0xff] }
   0x7   :  { %671 = vmatpush3.bf16.msra.mxu1 %v670_v12  ;;  %641 = vmatprep.subr.bf16.mxu0 %v640_v16  ;;  %v674_v25 = vpack.c.bf16 %v105_v22, %v104_v20  ;;  %v644_v26 = vpack.c.bf16 %v91_v24, %v90_v23  ;;  %v122_v27 = vld [vmem:[%s1245_s2 + $0x1a0] sm:$0xff]  ;;  %v123_v28 = vld [vmem:[%s1245_s2 + $0x1a8] sm:$0xff]  ;;  %v92_v35 = vld [vmem:[%s1245_s2 + $0xb0] sm:$0xff] }
   0x8   :  { %673 = vmatprep.subr.bf16.mxu1 %v672_v17  ;;  %v74_v29 = vld [vmem:[%s1245_s2 + $0x20] sm:$0xff]  ;;  %v676_v30 = vpack.c.bf16 %v123_v28, %v122_v27  ;;  %v75_v31 = vld [vmem:[%s1245_s2 + $0x28] sm:$0xff]  ;;  %v93_v36 = vld [vmem:[%s1245_s2 + $0xb8] sm:$0xff] }
   0x9   :  { %v106_v32 = vld [vmem:[%s1245_s2 + $0x120] sm:$0xff]  ;;  %v107_v33 = vld [vmem:[%s1245_s2 + $0x128] sm:$0xff]  ;;  %v646_v34 = vpack.c.bf16 %v75_v31, %v74_v29  ;;  %v124_v37 = vld [vmem:[%s1245_s2 + $0x1b0] sm:$0xff]  ;;  %v648_v39 = vpack.c.bf16 %v93_v36, %v92_v35 }
   0xa   :  { %643 = vmatpush3.bf16.msra.mxu0 %v642_v21  ;;  %v678_v38 = vpack.c.bf16 %v107_v33, %v106_v32  ;;  %v125_v40 = vld [vmem:[%s1245_s2 + $0x1b8] sm:$0xff]  ;;  %v76_v41 = vld [vmem:[%s1245_s2 + $0x30] sm:$0xff]  ;;  %v94_v46 = vld [vmem:[%s1245_s2 + $0xc0] sm:$0xff] }
   0xb   :  { %675 = vmatpush3.bf16.msra.mxu1 %v674_v25  ;;  %645 = vmatprep.subr.bf16.mxu0 %v644_v26  ;;  %v77_v42 = vld [vmem:[%s1245_s2 + $0x38] sm:$0xff]  ;;  %v680_v43 = vpack.c.bf16 %v125_v40, %v124_v37  ;;  %v108_v44 = vld [vmem:[%s1245_s2 + $0x130] sm:$0xff]  ;;  %v95_v47 = vld [vmem:[%s1245_s2 + $0xc8] sm:$0xff] }
   0xc   :  { %677 = vmatprep.subr.bf16.mxu1 %v676_v30  ;;  %v109_v45 = vld [vmem:[%s1245_s2 + $0x138] sm:$0xff]  ;;  %v126_v48 = vld [vmem:[%s1245_s2 + $0x1c0] sm:$0xff]  ;;  %v127_v49 = vld [vmem:[%s1245_s2 + $0x1c8] sm:$0xff]  ;;  %v650_v50 = vpack.c.bf16 %v77_v42, %v76_v41  ;;  %v652_v52 = vpack.c.bf16 %v95_v47, %v94_v46 }
   0xd   :  { %v682_v51 = vpack.c.bf16 %v109_v45, %v108_v44  ;;  %v78_v53 = vld [vmem:[%s1245_s2 + $0x40] sm:$0xff]  ;;  %v79_v54 = vld [vmem:[%s1245_s2 + $0x48] sm:$0xff]  ;;  %v684_v56 = vpack.c.bf16 %v127_v49, %v126_v48  ;;  %v96_v58 = vld [vmem:[%s1245_s2 + $0xd0] sm:$0xff] }
   0xe   :  { %647 = vmatpush3.bf16.msra.mxu0 %v646_v34  ;;  %v110_v55 = vld [vmem:[%s1245_s2 + $0x140] sm:$0xff]  ;;  %v111_v57 = vld [vmem:[%s1245_s2 + $0x148] sm:$0xff]  ;;  %v97_v59 = vld [vmem:[%s1245_s2 + $0xd8] sm:$0xff]  ;;  %v654_v62 = vpack.c.bf16 %v79_v54, %v78_v53 }
   0xf   :  { %679 = vmatpush3.bf16.msra.mxu1 %v678_v38  ;;  %649 = vmatprep.subr.bf16.mxu0 %v648_v39  ;;  %v128_v60 = vld [vmem:[%s1245_s2 + $0x1d0] sm:$0xff]  ;;  %v129_v61 = vld [vmem:[%s1245_s2 + $0x1d8] sm:$0xff]  ;;  %v686_v0 = vpack.c.bf16 %v111_v57, %v110_v55  ;;  %v656_v1 = vpack.c.bf16 %v97_v59, %v96_v58  ;;  %v98_v6 = vld [vmem:[%s1245_s2 + $0xe0] sm:$0xff] }
  0x10   :  { %681 = vmatprep.subr.bf16.mxu1 %v680_v43  ;;  %v80_v63 = vld [vmem:[%s1245_s2 + $0x50] sm:$0xff]  ;;  %v81_v2 = vld [vmem:[%s1245_s2 + $0x58] sm:$0xff]  ;;  %v688_v5 = vpack.c.bf16 %v129_v61, %v128_v60  ;;  %v99_v7 = vld [vmem:[%s1245_s2 + $0xe8] sm:$0xff] }
  0x11   :  { %v112_v3 = vld [vmem:[%s1245_s2 + $0x150] sm:$0xff]  ;;  %v113_v4 = vld [vmem:[%s1245_s2 + $0x158] sm:$0xff]  ;;  %v130_v8 = vld [vmem:[%s1245_s2 + $0x1e0] sm:$0xff]  ;;  %v658_v12 = vpack.c.bf16 %v81_v2, %v80_v63  ;;  %v660_v18 = vpack.c.bf16 %v99_v7, %v98_v6 }
  0x12   :  { %651 = vmatpush3.bf16.msra.mxu0 %v650_v50  ;;  %v131_v9 = vld [vmem:[%s1245_s2 + $0x1e8] sm:$0xff]  ;;  %v82_v10 = vld [vmem:[%s1245_s2 + $0x60] sm:$0xff]  ;;  %v100_v15 = vld [vmem:[%s1245_s2 + $0xf0] sm:$0xff]  ;;  %v690_v17 = vpack.c.bf16 %v113_v4, %v112_v3 }
  0x13   :  { %683 = vmatpush3.bf16.msra.mxu1 %v682_v51  ;;  %653 = vmatprep.subr.bf16.mxu0 %v652_v52  ;;  %v83_v11 = vld [vmem:[%s1245_s2 + $0x68] sm:$0xff]  ;;  %v114_v13 = vld [vmem:[%s1245_s2 + $0x160] sm:$0xff]  ;;  %v101_v16 = vld [vmem:[%s1245_s2 + $0xf8] sm:$0xff]  ;;  %v692_v23 = vpack.c.bf16 %v131_v9, %v130_v8 }
  0x14   :  { %685 = vmatprep.subr.bf16.mxu1 %v684_v56  ;;  %v115_v14 = vld [vmem:[%s1245_s2 + $0x168] sm:$0xff]  ;;  %v132_v19 = vld [vmem:[%s1245_s2 + $0x1f0] sm:$0xff]  ;;  %v133_v20 = vld [vmem:[%s1245_s2 + $0x1f8] sm:$0xff]  ;;  %v662_v32 = vpack.c.bf16 %v83_v11, %v82_v10  ;;  %v664_v37 = vpack.c.bf16 %v101_v16, %v100_v15 }
  0x15   :  { %v15_v21 = vld [vmem:[%s1246_s0 + $0x8] sm:$0xff]  ;;  %v17_v25 = vld [vmem:[%s1246_s0 + $0x18] sm:$0xff]  ;;  %v981_v27 = vld [vmem:[%s1246_s0] sm:$0xff]  ;;  %v694_v36 = vpack.c.bf16 %v115_v14, %v114_v13  ;;  %v696_v42 = vpack.c.bf16 %v133_v20, %v132_v19 }
  0x16   :  { %655 = vmatpush3.bf16.msra.mxu0 %v654_v62  ;;  %v23_v22 = vld [vmem:[%s1247_s1 + $0x8] sm:$0xff]  ;;  %v25_v26 = vld [vmem:[%s1247_s1 + $0x18] sm:$0xff]  ;;  %v22_v29 = vld [vmem:[%s1247_s1] sm:$0xff] }
  0x17   :  { %687 = vmatpush3.bf16.msra.mxu1 %v686_v0  ;;  %657 = vmatprep.subr.bf16.mxu0 %v656_v1  ;;  %v31_v24 = vmul.f32 0.1, %v23_v22  ;;  %v33_v28 = vmul.f32 0.1, %v25_v26  ;;  %v989_v30 = vld [vmem:[%s1246_s0 + $0x10] sm:$0xff]  ;;  %v85_v39 = vld [vmem:[%s1245_s2 + $0x78] sm:$0xff] }
  0x18   :  { %689 = vmatprep.subr.bf16.mxu1 %v688_v5  ;;  %v24_v31 = vld [vmem:[%s1247_s1 + $0x10] sm:$0xff]  ;;  %v30_v34 = vmul.f32 0.1, %v22_v29  ;;  %v117_v43 = vld [vmem:[%s1245_s2 + $0x178] sm:$0xff]  ;;  %v150_v47 = vld [vmem:[%s1245_s2 + $0x280] sm:$0xff] }
  0x19   :  { %v39_v33 = vadd.f32 %v31_v24, %v15_v21  ;;  %v32_v35 = vmul.f32 0.1, %v24_v31  ;;  %v84_v38 = vld [vmem:[%s1245_s2 + $0x70] sm:$0xff]  ;;  %v41_v41 = vadd.f32 %v33_v28, %v17_v25  ;;  %v151_v48 = vld [vmem:[%s1245_s2 + $0x288] sm:$0xff]  ;;  %v182_v50 = vld [vmem:[%s1245_s2 + $0x380] sm:$0xff] }
  0x1a   :  { %659 = vmatpush3.bf16.msra.mxu0 %v658_v12  ;;  %v116_v40 = vld [vmem:[%s1245_s2 + $0x170] sm:$0xff]  ;;  %v38_v45 = vadd.f32 %v30_v34, %v981_v27  ;;  %v183_v51 = vld [vmem:[%s1245_s2 + $0x388] sm:$0xff]  ;;  %v666_v52 = vpack.c.bf16 %v85_v39, %v84_v38  ;;  %v700_v58 = vpack.c.bf16 %v151_v48, %v150_v47  ;;  %v134_v59 = vld [vmem:[%s1245_s2 + $0x200] sm:$0xff] }
  0x1b   :  { %691 = vmatpush3.bf16.msra.mxu1 %v690_v17  ;;  %661 = vmatprep.subr.bf16.mxu0 %v660_v18  ;;  %v47_v44 = vmax.f32 %v39_v33, 0.0  ;;  %v40_v46 = vadd.f32 %v32_v35, %v989_v30  ;;  %v49_v49 = vmax.f32 %v41_v41, 0.0  ;;  %v698_v56 = vpack.c.bf16 %v117_v43, %v116_v40  ;;  %v135_v60 = vld [vmem:[%s1245_s2 + $0x208] sm:$0xff]  ;;  %v166_v61 = vld [vmem:[%s1245_s2 + $0x300] sm:$0xff]  ;;  %v152_v3 = vld [vmem:[%s1245_s2 + $0x290] sm:$0xff] }
  0x1c   :  { %693 = vmatprep.subr.bf16.mxu1 %v692_v23  ;;  %v46_v54 = vmax.f32 %v38_v45, 0.0  ;;  %v732_v1 = vpack.c.bf16 %v183_v51, %v182_v50  ;;  %v167_v2 = vld [vmem:[%s1245_s2 + $0x308] sm:$0xff]  ;;  %v153_v4 = vld [vmem:[%s1245_s2 + $0x298] sm:$0xff]  ;;  %v184_v6 = vld [vmem:[%s1245_s2 + $0x390] sm:$0xff]  ;;  %v702_v10 = vpack.c.bf16 %v135_v60, %v134_v59 }
  0x1d   :  { %v55_v53 = vmin.f32 %v47_v44, 1.0  ;;  %v48_v55 = vmax.f32 %v40_v46, 0.0  ;;  %v57_v57 = vmin.f32 %v49_v49, 1.0  ;;  %v185_v7 = vld [vmem:[%s1245_s2 + $0x398] sm:$0xff]  ;;  %v734_v11 = vpack.c.bf16 %v167_v2, %v166_v61  ;;  %v136_v13 = vld [vmem:[%s1245_s2 + $0x210] sm:$0xff]  ;;  %v154_v18 = vld [vmem:[%s1245_s2 + $0x2a0] sm:$0xff] }
  0x1e   :  { %663 = vmatpush3.bf16.msra.mxu0 %v662_v32  ;;  %v54_v63 = vmin.f32 %v46_v54, 1.0  ;;  %v704_v12 = vpack.c.bf16 %v153_v4, %v152_v3  ;;  %v137_v14 = vld [vmem:[%s1245_s2 + $0x218] sm:$0xff]  ;;  %v168_v15 = vld [vmem:[%s1245_s2 + $0x310] sm:$0xff]  ;;  %v736_v16 = vpack.c.bf16 %v185_v7, %v184_v6  ;;  %v155_v19 = vld [vmem:[%s1245_s2 + $0x2a8] sm:$0xff] }
  0x1f   :  { %695 = vmatpush3.bf16.msra.mxu1 %v694_v36  ;;  %665 = vmatprep.subr.bf16.mxu0 %v664_v37  ;;  %v63_v62 = vsub.f32 %v55_v53, %v15_v21  ;;  %v56_v0 = vmin.f32 %v48_v55, 1.0  ;;  %v65_v5 = vsub.f32 %v57_v57, %v17_v25  ;;  %v169_v17 = vld [vmem:[%s1245_s2 + $0x318] sm:$0xff]  ;;  %v186_v20 = vld [vmem:[%s1245_s2 + $0x3a0] sm:$0xff]  ;;  %v187_v21 = vld [vmem:[%s1245_s2 + $0x3a8] sm:$0xff]  ;;  %v706_v22 = vpack.c.bf16 %v137_v14, %v136_v13 }
  0x20   :  { %697 = vmatprep.subr.bf16.mxu1 %v696_v42  ;;  %v62_v8 = vsub.f32 %v54_v63, %v981_v27  ;;  %v738_v23 = vpack.c.bf16 %v169_v17, %v168_v15  ;;  %v708_v24 = vpack.c.bf16 %v155_v19, %v154_v18  ;;  %v138_v25 = vld [vmem:[%s1245_s2 + $0x220] sm:$0xff]  ;;  %v139_v26 = vld [vmem:[%s1245_s2 + $0x228] sm:$0xff]  ;;  %v740_v28 = vpack.c.bf16 %v187_v21, %v186_v20  ;;  %v157_v31 = vld [vmem:[%s1245_s2 + $0x2b8] sm:$0xff] }
  0x21   :  { %262 = vmatprep.mubr.f32.mxu0 %v63_v62  ;;  %v64_v9 = vsub.f32 %v56_v0, %v989_v30  ;;  %332 = vmatprep.mubr.f32.mxu1 %v65_v5  ;;  %v170_v27 = vld [vmem:[%s1245_s2 + $0x320] sm:$0xff]  ;;  %v171_v29 = vld [vmem:[%s1245_s2 + $0x328] sm:$0xff]  ;;  %v156_v30 = vld [vmem:[%s1245_s2 + $0x2b0] sm:$0xff]  ;;  %v710_v34 = vpack.c.bf16 %v139_v26, %v138_v25 }
  0x22   :  { %667 = vmatpush3.bf16.msra.mxu0 %v666_v52  ;;  %v188_v32 = vld [vmem:[%s1245_s2 + $0x3b0] sm:$0xff]  ;;  %v189_v33 = vld [vmem:[%s1245_s2 + $0x3b8] sm:$0xff]  ;;  %v742_v35 = vpack.c.bf16 %v171_v29, %v170_v27  ;;  %v712_v36 = vpack.c.bf16 %v157_v31, %v156_v30  ;;  %v158_v42 = vld [vmem:[%s1245_s2 + $0x2c0] sm:$0xff] }
  0x23   :  { %699 = vmatpush3.bf16.msra.mxu1 %v698_v56  ;;  %701 = vmatprep.subr.bf16.mxu0 %v700_v58  ;;  %v140_v37 = vld [vmem:[%s1245_s2 + $0x230] sm:$0xff]  ;;  %v141_v38 = vld [vmem:[%s1245_s2 + $0x238] sm:$0xff]  ;;  %v744_v40 = vpack.c.bf16 %v189_v33, %v188_v32  ;;  %v159_v43 = vld [vmem:[%s1245_s2 + $0x2c8] sm:$0xff] }
  0x24   :  { %733 = vmatprep.subr.bf16.mxu1 %v732_v1  ;;  %v172_v39 = vld [vmem:[%s1245_s2 + $0x330] sm:$0xff]  ;;  %v173_v41 = vld [vmem:[%s1245_s2 + $0x338] sm:$0xff]  ;;  %v142_v44 = vld [vmem:[%s1245_s2 + $0x240] sm:$0xff]  ;;  %v714_v48 = vpack.c.bf16 %v141_v38, %v140_v37  ;;  %v716_v53 = vpack.c.bf16 %v159_v43, %v158_v42 }
  0x25   :  { %263 = vmatmul.mubr.f32.vlgmr.msra.gmra.mrb[0].mxu0 %v62_v8  ;;  %v143_v45 = vld [vmem:[%s1245_s2 + $0x248] sm:$0xff]  ;;  %v190_v46 = vld [vmem:[%s1245_s2 + $0x3c0] sm:$0xff]  ;;  %v160_v51 = vld [vmem:[%s1245_s2 + $0x2d0] sm:$0xff]  ;;  %v746_v52 = vpack.c.bf16 %v173_v41, %v172_v39 }
  0x26   :  { %333 = vmatmul.mubr.f32.vlgmr.msra.gmra.mrb[0].mxu1 %v64_v9  ;;  %703 = vmatpush3.bf16.msra.mxu0 %v702_v10  ;;  %v191_v47 = vld [vmem:[%s1245_s2 + $0x3c8] sm:$0xff]  ;;  %v174_v49 = vld [vmem:[%s1245_s2 + $0x340] sm:$0xff]  ;;  %v161_v54 = vld [vmem:[%s1245_s2 + $0x2d8] sm:$0xff]  ;;  %v718_v1 = vpack.c.bf16 %v143_v45, %v142_v44 }
  0x27   :  { %735 = vmatpush3.bf16.msra.mxu1 %v734_v11  ;;  %705 = vmatprep.subr.bf16.mxu0 %v704_v12  ;;  %v175_v50 = vld [vmem:[%s1245_s2 + $0x348] sm:$0xff]  ;;  %v192_v55 = vld [vmem:[%s1245_s2 + $0x3d0] sm:$0xff]  ;;  %v193_v56 = vld [vmem:[%s1245_s2 + $0x3d8] sm:$0xff]  ;;  %v748_v57 = vpack.c.bf16 %v191_v47, %v190_v46  ;;  %v720_v7 = vpack.c.bf16 %v161_v54, %v160_v51 }
  0x28   :  { %737 = vmatprep.subr.bf16.mxu1 %v736_v16  ;;  %v1145_v58 = vld [vmem:[%s1246_s0 + $0x28] sm:$0xff]  ;;  %v26_v60 = vld [vmem:[%s1247_s1 + $0x20] sm:$0xff]  ;;  %v1156_v63 = vld [vmem:[%s1246_s0 + $0x38] sm:$0xff]  ;;  %v750_v6 = vpack.c.bf16 %v175_v50, %v174_v49  ;;  %v752_v13 = vpack.c.bf16 %v193_v56, %v192_v55 }
  0x29   :  { %v27_v59 = vld [vmem:[%s1247_s1 + $0x28] sm:$0xff]  ;;  %v34_v62 = vmul.f32 0.1, %v26_v60  ;;  %v29_v0 = vld [vmem:[%s1247_s1 + $0x38] sm:$0xff]  ;;  %v144_v2 = vld [vmem:[%s1245_s2 + $0x250] sm:$0xff] }
  0x2a   :  { %707 = vmatpush3.bf16.msra.mxu0 %v706_v22  ;;  %v35_v61 = vmul.f32 0.1, %v27_v59  ;;  %v1167_v3 = vld [vmem:[%s1246_s0 + $0x20] sm:$0xff]  ;;  %v37_v4 = vmul.f32 0.1, %v29_v0  ;;  %v28_v5 = vld [vmem:[%s1247_s1 + $0x30] sm:$0xff] }
  0x2b   :  { %739 = vmatpush3.bf16.msra.mxu1 %v738_v23  ;;  %709 = vmatprep.subr.bf16.mxu0 %v708_v24  ;;  %v145_v8 = vld [vmem:[%s1245_s2 + $0x258] sm:$0xff]  ;;  %v176_v9 = vld [vmem:[%s1245_s2 + $0x350] sm:$0xff]  ;;  %v36_v12 = vmul.f32 0.1, %v28_v5  ;;  %v162_v15 = vld [vmem:[%s1245_s2 + $0x2e0] sm:$0xff]  ;;  %v42_v21 = vadd.f32 %v34_v62, %v1167_v3 }
  0x2c   :  { %741 = vmatprep.subr.bf16.mxu1 %v740_v28  ;;  %v43_v10 = vadd.f32 %v35_v61, %v1145_v58  ;;  %v1182_v11 = vld [vmem:[%s1246_s0 + $0x30] sm:$0xff]  ;;  %v177_v14 = vld [vmem:[%s1245_s2 + $0x358] sm:$0xff]  ;;  %v163_v16 = vld [vmem:[%s1245_s2 + $0x2e8] sm:$0xff]  ;;  %v45_v17 = vadd.f32 %v37_v4, %v1156_v63  ;;  %v722_v22 = vpack.c.bf16 %v145_v8, %v144_v2 }
  0x2d   :  { %v194_v18 = vld [vmem:[%s1245_s2 + $0x3e0] sm:$0xff]  ;;  %v195_v19 = vld [vmem:[%s1245_s2 + $0x3e8] sm:$0xff]  ;;  %v44_v24 = vadd.f32 %v36_v12, %v1182_v11  ;;  %v754_v25 = vpack.c.bf16 %v177_v14, %v176_v9  ;;  %v724_v26 = vpack.c.bf16 %v163_v16, %v162_v15  ;;  %v164_v33 = vld [vmem:[%s1245_s2 + $0x2f0] sm:$0xff]  ;;  %v50_v39 = vmax.f32 %v42_v21, 0.0 }
  0x2e   :  { %711 = vmatpush3.bf16.msra.mxu0 %v710_v34  ;;  %v51_v20 = vmax.f32 %v43_v10, 0.0  ;;  %v53_v23 = vmax.f32 %v45_v17, 0.0  ;;  %v146_v27 = vld [vmem:[%s1245_s2 + $0x260] sm:$0xff]  ;;  %v147_v28 = vld [vmem:[%s1245_s2 + $0x268] sm:$0xff]  ;;  %v756_v31 = vpack.c.bf16 %v195_v19, %v194_v18  ;;  %v165_v34 = vld [vmem:[%s1245_s2 + $0x2f8] sm:$0xff] }
  0x2f   :  { %743 = vmatpush3.bf16.msra.mxu1 %v742_v35  ;;  %713 = vmatprep.subr.bf16.mxu0 %v712_v36  ;;  %v178_v29 = vld [vmem:[%s1245_s2 + $0x360] sm:$0xff]  ;;  %v179_v32 = vld [vmem:[%s1245_s2 + $0x368] sm:$0xff]  ;;  %v196_v36 = vld [vmem:[%s1245_s2 + $0x3f0] sm:$0xff]  ;;  %v52_v42 = vmax.f32 %v44_v24, 0.0  ;;  %v728_v44 = vpack.c.bf16 %v165_v34, %v164_v33  ;;  %v58_v50 = vmin.f32 %v50_v39, 1.0 }
  0x30   :  { %745 = vmatprep.subr.bf16.mxu1 %v744_v40  ;;  %v59_v30 = vmin.f32 %v51_v20, 1.0  ;;  %v61_v35 = vmin.f32 %v53_v23, 1.0  ;;  %v197_v37 = vld [vmem:[%s1245_s2 + $0x3f8] sm:$0xff]  ;;  %v726_v40 = vpack.c.bf16 %v147_v28, %v146_v27  ;;  %v758_v43 = vpack.c.bf16 %v179_v32, %v178_v29  ;;  %v148_v45 = vld [vmem:[%s1245_s2 + $0x270] sm:$0xff] }
  0x31   :  { %v149_v46 = vld [vmem:[%s1245_s2 + $0x278] sm:$0xff]  ;;  %v760_v47 = vpack.c.bf16 %v197_v37, %v196_v36  ;;  %v66_v54 = vsub.f32 %v58_v50, %v1167_v3 }
  0x32   :  { %715 = vmatpush3.bf16.msra.mxu0 %v714_v48  ;;  %v67_v38 = vsub.f32 %v59_v30, %v1145_v58  ;;  %v69_v41 = vsub.f32 %v61_v35, %v1156_v63  ;;  %v180_v48 = vld [vmem:[%s1245_s2 + $0x370] sm:$0xff]  ;;  %v181_v49 = vld [vmem:[%s1245_s2 + $0x378] sm:$0xff]  ;;  %v730_v51 = vpack.c.bf16 %v149_v46, %v148_v45 }
  0x33   :  { %747 = vmatpush3.bf16.msra.mxu1 %v746_v52  ;;  %717 = vmatprep.subr.bf16.mxu0 %v716_v53  ;;  %v60_v52 = vmin.f32 %v52_v42, 1.0  ;;  %v762_v53 = vpack.c.bf16 %v181_v49, %v180_v48 }
  0x34   :  { %749 = vmatprep.subr.bf16.mxu1 %v748_v57  ;;  %402 = vmatprep.mubr.f32.mxu0 %v67_v38 }
  0x35   :  { %472 = vmatprep.mubr.f32.mxu1 %v69_v41  ;;  %v68_v55 = vsub.f32 %v60_v52, %v1182_v11 }
  0x36   :  { %719 = vmatpush3.bf16.msra.mxu0 %v718_v1 }
  0x37   :  { %751 = vmatpush3.bf16.msra.mxu1 %v750_v6  ;;  %721 = vmatprep.subr.bf16.mxu0 %v720_v7 }
  0x38   :  { %753 = vmatprep.subr.bf16.mxu1 %v752_v13 }
  0x3a   :  { %723 = vmatpush3.bf16.msra.mxu0 %v722_v22 }
  0x3b   :  { %755 = vmatpush3.bf16.msra.mxu1 %v754_v25  ;;  %725 = vmatprep.subr.bf16.mxu0 %v724_v26 }
  0x3c   :  { %757 = vmatprep.subr.bf16.mxu1 %v756_v31 }
  0x3e   :  { %727 = vmatpush3.bf16.msra.mxu0 %v726_v40 }
  0x3f   :  { %759 = vmatpush3.bf16.msra.mxu1 %v758_v43  ;;  %729 = vmatprep.subr.bf16.mxu0 %v728_v44 }
  0x40   :  { %761 = vmatprep.subr.bf16.mxu1 %v760_v47 }
  0x42   :  { %731 = vmatpush3.bf16.msra.mxu0 %v730_v51 }
  0x43   :  { %763 = vmatpush3.bf16.msra.mxu1 %v762_v53 }
  0x45   :  { %403 = vmatmul.mubr.f32.vlgmr.msra.gmra.mrb[2].mxu0 %v66_v54 }
  0x46   :  { %473 = vmatmul.mubr.f32.vlgmr.msra.gmra.mrb[2].mxu1 %v68_v55 }
  0xf8   :  { %v528_v56 = vpop.f32.mrb[0].mxu0 }
  0xf9   :  { %v563_v57 = vpop.f32.mrb[0].mxu1  ;;  %v529_v58 = vpop.f32.mrb[1].mxu0 }
  0xfa   :  { %v530_v59 = vadd.f32 %v529_v58, %v528_v56  ;;  %v564_v60 = vpop.f32.mrb[1].mxu1 }
  0xfb   :  { %v565_v61 = vadd.f32 %v564_v60, %v563_v57 }
  0xfd   :  { %v335_v62 = vadd.f32 %v565_v61, %v530_v59 }
 0x118   :  { %v598_v63 = vpop.f32.mrb[2].mxu0 }
 0x119   :  { %v599_v0 = vpop.f32.mrb[3].mxu0  ;;  %v633_v1 = vpop.f32.mrb[2].mxu1 }
 0x11a   :  { %v600_v2 = vadd.f32 %v599_v0, %v598_v63  ;;  %v634_v4 = vpop.f32.mrb[3].mxu1 }
 0x11b   :  { %v635_v5 = vadd.f32 %v634_v4, %v633_v1 }
 0x11c   :  { %v405_v3 = vadd.f32 %v600_v2, %v335_v62 }
 0x11e   :  { %v475_v6 = vadd.f32 %v635_v5, %v405_v3 }
 0x120   :  { %v478_v7 = vmul.f32 %v475_v6, %v475_v6 }
 0x122   :  { %v480_v8 = vsel %vm479_vm0, %v478_v7, 0.0 }
 0x123   :  { %481 = vadd.xlane.f32.xlu0 %v480_v8 }
 0x1b0   :  { %v482_v9 = vpop.xlane.xlu0 %481 }
 0x1b1   :  { %764 = vrsqrt.f32 %v482_v9  ;;  %vm485_vm1 = vcmp.eq.f32.partialorder %v482_v9, inf  ;;  %v488_v12 = vand.u32 2147483648, %v482_v9  ;;  %vm487_vm3 = vcmp.eq.f32.partialorder %v482_v9, 0.0 }
 0x1bb   :  { %v765_v10 = vpop.eup %764 }
 0x1bc   :  { %v484_v11 = vmul.f32 %v765_v10, %v482_v9 }
 0x1be   :  { %v486_v13 = vsel %vm485_vm1, %v482_v9, %v484_v11 }
 0x1bf   :  { %v489_v14 = vsel %vm487_vm3, %v488_v12, %v486_v13 }
 0x1c0   :  { %491 = vst.msk [vmem:[%s1248_s3] sm:$0xff] %vm490_vm2, %v489_v14 }

</bundles_post_ra>
